<compile_context>
chip_gen: v5e
topology: v5e:2x2
jax: 0.10.0
libtpu: 0.0.40
codegen_flags: <defaults>
</compile_context>

<pallas_src>
import jax
import jax.numpy as jnp
from jax.experimental import pallas as pl
from jax.experimental.pallas import tpu as pltpu

LANE = 128  # TPU lane width; the class dim is padded to this so the logits store is lane-dense


def task_module_kernel(x_ref, w1bd_ref, b1c_ref, w2t_ref, sel_ref, b2p_ref, o_ref):
    # x_ref   : (B*C, HW)       input, NCHW with (batch, channel) flattened onto sublanes,
    #                           spatial flattened onto lanes (HW = 256, lane-dense)
    # w1bd_ref: (B*HID, B*C)    block-diagonal kron(I_B, W1^T) encoder weight
    # b1c_ref : (B*HID, 1)      encoder bias tiled over batch (broadcasts over lanes)
    # w2t_ref : (B*HID, NPAD)   head weight, pre-scaled by 1/HW, tiled over batch, zero-padded
    # sel_ref : (B, B*HID)      0/1 selector, kron(I_B, ones(1, HID)) -> per-batch group sum
    # b2p_ref : (1, NPAD)       head bias, zero-padded
    # o_ref   : (B, NPAD)       padded logits (single lane-dense store)

    # Shared encoder for the whole batch in one MXU matmul; lanes = HW (dense 256).
    hT = jnp.dot(w1bd_ref[...], x_ref[...], preferred_element_type=jnp.float32)  # (B*HID, HW)
    hT = jnp.maximum(hT + b1c_ref[...], 0.0)                                     # bias + ReLU

    # Global average pool: lane-axis (spatial) sum; the 1/HW scale is folded into w2t.
    pooled = jnp.sum(hT, axis=1, keepdims=True)                                  # (B*HID, 1)

    # Task head: broadcast-multiply by the batch-tiled head weight, then one selector
    # matmul does the per-batch reduction over HID and yields lane-dense (B, NPAD) logits.
    prod = pooled * w2t_ref[...]                                                 # (B*HID, NPAD)
    logits = jnp.dot(sel_ref[...], prod, preferred_element_type=jnp.float32)     # (B, NPAD)
    logits = logits + b2p_ref[...]

    o_ref[...] = logits.astype(o_ref.dtype)


def task_module_forward(x_nchw, w1, b1, w2, b2):
    """TaskModule.forward: x_nchw [B, C, H, W] f32 -> task logits [B, NCLS]."""
    B, C, H, W = x_nchw.shape
    HW = H * W
    HID = w1.shape[1]
    NCLS = w2.shape[1]
    NPAD = max(LANE, ((NCLS + LANE - 1) // LANE) * LANE)

    # Input layout: free reshape of contiguous NCHW -> (B*C, HW); HW lands on lanes.
    x_flat = x_nchw.reshape(B * C, HW)

    # Parameter-only layout prep (tiny; hoistable / constant-foldable in a real model):
    eye_b = jnp.eye(B, dtype=x_nchw.dtype)
    w1bd = jnp.kron(eye_b, w1.T)                                  # (B*HID, B*C) block-diag
    b1c = jnp.tile(b1.reshape(HID, 1), (B, 1))                    # (B*HID, 1)
    w2p = jnp.pad(w2 / HW, ((0, 0), (0, NPAD - NCLS)))            # fold 1/HW pooling scale
    w2t = jnp.tile(w2p, (B, 1))                                   # (B*HID, NPAD)
    sel = jnp.kron(eye_b, jnp.ones((1, HID), dtype=x_nchw.dtype)) # (B, B*HID) group-sum selector
    b2p = jnp.pad(b2, ((0, 0), (0, NPAD - NCLS)))                 # (1, NPAD)

    out_padded = pl.pallas_call(
        task_module_kernel,
        out_shape=jax.ShapeDtypeStruct((B, NPAD), jnp.float32),
        in_specs=[pl.BlockSpec(memory_space=pltpu.MemorySpace.VMEM) for _ in range(6)],
        out_specs=pl.BlockSpec(memory_space=pltpu.MemorySpace.VMEM),
    )(x_flat, w1bd, b1c, w2t, sel, b2p)
    return out_padded[:, :NCLS]


def reference_forward(x_nchw, w1, b1, w2, b2):
    B, C, H, W = x_nchw.shape
    x = jnp.transpose(x_nchw, (0, 2, 3, 1)).reshape(B, H * W, C)
    h = jnp.maximum(jnp.einsum("bsc,ch->bsh", x, w1) + b1, 0.0)
    pooled = jnp.mean(h, axis=1)
    return pooled @ w2 + b2[0]


if __name__ == "__main__":
    B, C, H, W = 2, 4, 16, 16
    HID, NCLS = 32, 8

    key = jax.random.PRNGKey(0)
    kx, kw1, kb1, kw2, kb2 = jax.random.split(key, 5)

    x = jax.random.normal(kx, (B, C, H, W), dtype=jnp.float32)
    # deterministic synthetic parameters (shapes implied by the module's components)
    w1 = jax.random.normal(kw1, (C, HID), dtype=jnp.float32) * 0.1
    b1 = jax.random.normal(kb1, (1, HID), dtype=jnp.float32) * 0.1
    w2 = jax.random.normal(kw2, (HID, NCLS), dtype=jnp.float32) * 0.1
    b2 = jax.random.normal(kb2, (1, NCLS), dtype=jnp.float32) * 0.1

    out = task_module_forward(x, w1, b1, w2, b2)
    jax.block_until_ready(out)

    ref = reference_forward(x, w1, b1, w2, b2)
    assert out.shape == (B, NCLS)
    assert jnp.allclose(out, ref, atol=1e-4, rtol=1e-4), "mismatch vs reference"

    print("KERNEL_OK")
</pallas_src>

<mosaic_0001>
module attributes {stable_mosaic.version = 11 : i64} {
  func.func @task_module_kernel(%arg0: memref<8x256xf32, #tpu.memory_space<vmem>>, %arg1: memref<64x8xf32, #tpu.memory_space<vmem>>, %arg2: memref<64x1xf32, #tpu.memory_space<vmem>>, %arg3: memref<64x128xf32, #tpu.memory_space<vmem>>, %arg4: memref<2x64xf32, #tpu.memory_space<vmem>>, %arg5: memref<1x128xf32, #tpu.memory_space<vmem>>, %arg6: memref<2x128xf32, #tpu.memory_space<vmem>>) attributes {dimension_semantics = [], scalar_prefetch = 0 : i64, scratch_operands = 0 : i64, tpu.core_type = #tpu.core_type<tc>} {
    %c0 = arith.constant 0 : index
    %c0_0 = arith.constant 0 : index
    %0 = vector.load %arg1[%c0, %c0_0] : memref<64x8xf32, #tpu.memory_space<vmem>>, vector<64x8xf32>
    %c0_1 = arith.constant 0 : index
    %c0_2 = arith.constant 0 : index
    %1 = vector.load %arg0[%c0_1, %c0_2] : memref<8x256xf32, #tpu.memory_space<vmem>>, vector<8x256xf32>
    %cst = arith.constant dense<0.000000e+00> : vector<64x256xf32>
    %2 = tpu.matmul %0, %1, %cst {dimension_numbers = #tpu.dot_dimension_numbers<[1], [0], [0], [1], [0, 0, 1, 1], [], []>} : vector<64x8xf32>, vector<8x256xf32>, vector<64x256xf32> -> vector<64x256xf32>
    %c0_3 = arith.constant 0 : index
    %c0_4 = arith.constant 0 : index
    %3 = vector.load %arg2[%c0_3, %c0_4] : memref<64x1xf32, #tpu.memory_space<vmem>>, vector<64x1xf32>
    %4 = vector.broadcast %3 : vector<64x1xf32> to vector<64x256xf32>
    %5 = arith.addf %2, %4 : vector<64x256xf32>
    %cst_5 = arith.constant 0.000000e+00 : f32
    %6 = vector.broadcast %cst_5 : f32 to vector<64x256xf32>
    %7 = arith.maximumf %5, %6 : vector<64x256xf32>
    %cst_6 = arith.constant dense<0.000000e+00> : vector<64xf32>
    %8 = vector.multi_reduction <add>, %7, %cst_6 [1] : vector<64x256xf32> to vector<64xf32>
    %9 = vector.shape_cast %8 : vector<64xf32> to vector<64x1xf32>
    %c0_7 = arith.constant 0 : index
    %c0_8 = arith.constant 0 : index
    %10 = vector.load %arg3[%c0_7, %c0_8] : memref<64x128xf32, #tpu.memory_space<vmem>>, vector<64x128xf32>
    %11 = vector.broadcast %9 : vector<64x1xf32> to vector<64x128xf32>
    %12 = arith.mulf %11, %10 : vector<64x128xf32>
    %c0_9 = arith.constant 0 : index
    %c0_10 = arith.constant 0 : index
    %13 = vector.load %arg4[%c0_9, %c0_10] : memref<2x64xf32, #tpu.memory_space<vmem>>, vector<2x64xf32>
    %cst_11 = arith.constant dense<0.000000e+00> : vector<2x128xf32>
    %14 = tpu.matmul %13, %12, %cst_11 {dimension_numbers = #tpu.dot_dimension_numbers<[1], [0], [0], [1], [0, 0, 1, 1], [], []>} : vector<2x64xf32>, vector<64x128xf32>, vector<2x128xf32> -> vector<2x128xf32>
    %c0_12 = arith.constant 0 : index
    %c0_13 = arith.constant 0 : index
    %15 = vector.load %arg5[%c0_12, %c0_13] : memref<1x128xf32, #tpu.memory_space<vmem>>, vector<1x128xf32>
    %16 = vector.broadcast %15 : vector<1x128xf32> to vector<2x128xf32>
    %17 = arith.addf %14, %16 : vector<2x128xf32>
    %c0_14 = arith.constant 0 : index
    %c0_15 = arith.constant 0 : index
    %18 = vector.load %arg6[%c0_14, %c0_15] : memref<2x128xf32, #tpu.memory_space<vmem>>, vector<2x128xf32>
    tpu.vector_store %arg6[%c0_14, %c0_15], %17 {strides = array<i32>} : memref<2x128xf32, #tpu.memory_space<vmem>>, vector<2x128xf32>,
    return
  }
}

</mosaic_0001>

<bundles_post_ra>
// kernel: tpu_custom_call.1
= control target key start
LH: loop header
LB: loop body
LE: loop exit
PB: predicated region body
PF: predicated region fallthrough
CT: control target
= control target key end

     0   :  { %vm82_vm0 = vcmask 64512   ;;  %v342_v5 = vmov 0   ;;  %s488_s0 = inlined_call_operand.vmem [shape: f32[8,256], index: 0, kind: input, shape index: {}]   ;;  %s489_s1 = inlined_call_operand.vmem [shape: f32[64,8], index: 1, kind: input, shape index: {}]   ;;  %s490_s2 = inlined_call_operand.vmem [shape: f32[64,1], index: 2, kind: input, shape index: {}]   ;;  %s491_s3 = inlined_call_operand.vmem [shape: f32[64,128], index: 3, kind: input, shape index: {}]   ;;  %s492_s4 = inlined_call_operand.vmem [shape: f32[2,64], index: 4, kind: input, shape index: {}]   ;;  %s493_s5 = inlined_call_operand.vmem [shape: f32[1,128], index: 5, kind: input, shape index: {}]   ;;  %s494_s6 = inlined_call_operand.hbm [shape: f32[2,128], index: 6, kind: output, shape index: {}]  }
   0x1   :  { %v32_v0 = vld [vmem:[%s488_s0] sm:$0xff]  ;;  %v33_v1 = vld [vmem:[%s488_s0 + $0x8] sm:$0xff]  ;;  %313 = vset.pattern.permute.xlu1 %v342_v5  ;;  %v41_v6 = vld [vmem:[%s490_s2 + $0x38] sm:$0xff]  ;;  %312 = vset.pattern.permute.xlu0 %v342_v5 }
   0x2   :  { %v24_v2 = vld [vmem:[%s489_s1] sm:$0xff]  ;;  %122 = vmatpush.msra.mxu0 %v32_v0  ;;  %308 = vmatpush.msra.mxu3 %v32_v0  ;;  %v29_v3 = vld [vmem:[%s489_s1 + $0x28] sm:$0xff]  ;;  %v37_v7 = vld [vmem:[%s490_s2 + $0x18] sm:$0xff] }
   0x3   :  { %163 = vmatpush.msra.mxu1 %v33_v1  ;;  %309 = vmatpush.msra.mxu2 %v33_v1  ;;  %v39_v4 = vld [vmem:[%s490_s2 + $0x28] sm:$0xff] }
   0x4   :  { %291 = vmatmul.msk.f32.vlgmr.msra.gmra.mxu0 %vm82_vm0, %v24_v2  ;;  %296 = vmatmul.msk.f32.vlgmr.msra.gmra.mxu3 %vm82_vm0, %v29_v3 }
   0x5   :  { %299 = vmatmul.msk.f32.vlgmr.msra.gmra.mxu1 %vm82_vm0, %v24_v2  ;;  %304 = vmatmul.msk.f32.vlgmr.msra.gmra.mxu2 %vm82_vm0, %v29_v3 }
   0x6   :  { %69 = vperm.xlu1 %313, %v39_v4   ;;  %314 = vset.pattern.permute.xlu2 %v342_v5 }
   0x7   :  { %11 = vsyncpa [#allocation3], 0  ;;  %79 = vperm.xlu0 %312, %v41_v6   ;;  %59 = vperm.xlu2 %314, %v37_v7   ;;  %v25_v8 = vld [vmem:[%s489_s1 + $0x8] sm:$0xff]  ;;  %v30_v9 = vld [vmem:[%s489_s1 + $0x30] sm:$0xff]  ;;  %vm250_vm1 = vcmask 523264   ;;  %s343_s25 = smov [#allocation2]  }
   0x8   :  { %v38_v10 = vld [vmem:[%s490_s2 + $0x20] sm:$0xff]  ;;  %v40_v11 = vld [vmem:[%s490_s2 + $0x30] sm:$0xff]  ;;  %v31_v14 = vld [vmem:[%s489_s1 + $0x38] sm:$0xff]  ;;  %s280_s26 = sshll.u32 %s343_s25, 4  ;;  %s282_s28 = sshll.u32 %s494_s6, 4  ;;  %s281_s26 = int_to_ptr.vmem [resolvable:$true] %s280_s26  ;;  %s283_s28 = int_to_ptr.hbm [resolvable:$true] %s282_s28 }
   0x9   :  { %v36_v12 = vld [vmem:[%s490_s2 + $0x10] sm:$0xff]  ;;  %v34_v15 = vld [vmem:[%s490_s2] sm:$0xff]  ;;  %v35_v16 = vld [vmem:[%s490_s2 + $0x8] sm:$0xff] }
   0xa   :  { %v26_v13 = vld [vmem:[%s489_s1 + $0x10] sm:$0xff]  ;;  %v27_v17 = vld [vmem:[%s489_s1 + $0x18] sm:$0xff]  ;;  %v28_v18 = vld [vmem:[%s489_s1 + $0x20] sm:$0xff] }
   0xc   :  { %292 = vmatmul.msk.f32.gmra.mxu0 %vm82_vm0, %v25_v8  ;;  %297 = vmatmul.msk.f32.gmra.mxu3 %vm82_vm0, %v30_v9 }
   0xd   :  { %300 = vmatmul.msk.f32.gmra.mxu1 %vm82_vm0, %v25_v8  ;;  %305 = vmatmul.msk.f32.gmra.mxu2 %vm82_vm0, %v30_v9 }
   0xe   :  { %64 = vperm.xlu1 %313, %v38_v10  }
   0xf   :  { %74 = vperm.xlu0 %312, %v40_v11   ;;  %54 = vperm.xlu2 %314, %v36_v12  }
  0x14   :  { %293 = vmatmul.msk.f32.gmra.mxu0 %vm82_vm0, %v26_v13  ;;  %298 = vmatmul.msk.f32.gmra.mxu3 %vm82_vm0, %v31_v14 }
  0x15   :  { %301 = vmatmul.msk.f32.gmra.mxu1 %vm82_vm0, %v26_v13  ;;  %306 = vmatmul.msk.f32.gmra.mxu2 %vm82_vm0, %v31_v14 }
  0x16   :  { %44 = vperm.xlu1 %313, %v34_v15  }
  0x17   :  { %49 = vperm.xlu0 %312, %v35_v16  }
  0x1c   :  { %294 = vmatmul.msk.f32.gmra.mxu0 %vm82_vm0, %v27_v17 }
  0x1d   :  { %302 = vmatmul.msk.f32.gmra.mxu1 %vm82_vm0, %v27_v17 }
  0x24   :  { %295 = vmatmul.msk.f32.gmra.mxu0 %vm82_vm0, %v28_v18 }
  0x25   :  { %303 = vmatmul.msk.f32.gmra.mxu1 %vm82_vm0, %v28_v18 }
  0x61   :  { %v60_v23 = vpop.permute.xlu2 %59 }
  0x69   :  { %v55_v40 = vpop.permute.xlu2 %54 }
  0x78   :  { %v70_v24 = vpop.permute.xlu1 %69 }
  0x79   :  { %v80_v19 = vpop.permute.xlu0 %79 }
  0x80   :  { %v65_v4 = vpop.permute.xlu1 %64 }
  0x81   :  { %v449_v20 = vpop.f32.mrf.mxu0  ;;  %v75_v22 = vpop.permute.xlu0 %74 }
  0x82   :  { %v451_v21 = vpop.f32.mrf.mxu1 }
  0x87   :  { %v139_v25 = vpop.f32.mrf.mxu3 }
  0x88   :  { %v140_v26 = vadd.f32 %v139_v25, %v70_v24  ;;  %v180_v27 = vpop.f32.mrf.mxu2  ;;  %v45_v12 = vpop.permute.xlu1 %44 }
  0x89   :  { %v127_v28 = vpop.f32.mrf.mxu0  ;;  %v181_v29 = vadd.f32 %v180_v27, %v70_v24  ;;  %v50_v31 = vpop.permute.xlu0 %49  ;;  %v125_v13 = vadd.f32 %v449_v20, %v45_v12  ;;  %v166_v14 = vadd.f32 %v451_v21, %v45_v12  ;;  %v234_v20 = vld [vmem:[%s491_s3 + $0x28] sm:$0xff] }
  0x8a   :  { %v168_v30 = vpop.f32.mrf.mxu1  ;;  %v199_v32 = vmax.f32 %v140_v26, 0.0  ;;  %v128_v34 = vadd.f32 %v127_v28, %v50_v31 }
  0x8b   :  { %v200_v33 = vmax.f32 %v181_v29, 0.0  ;;  %v169_v35 = vadd.f32 %v168_v30, %v50_v31  ;;  %v189_v16 = vmax.f32 %v125_v13, 0.0  ;;  %v190_v17 = vmax.f32 %v166_v14, 0.0  ;;  %v233_v29 = vld [vmem:[%s491_s3 + $0x20] sm:$0xff]  ;;  %v232_v30 = vld [vmem:[%s491_s3 + $0x18] sm:$0xff] }
  0x8c   :  { %v191_v37 = vmax.f32 %v128_v34, 0.0 }
  0x8d   :  { %v220_v36 = vadd.f32 %v200_v33, %v199_v32  ;;  %v192_v38 = vmax.f32 %v169_v35, 0.0  ;;  %v205_v18 = vadd.f32 %v190_v17, %v189_v16  ;;  %v231_v33 = vld [vmem:[%s491_s3 + $0x10] sm:$0xff] }
  0x8f   :  { %221 = vadd.xlane.f32.xlu1 %v220_v36  ;;  %v142_v39 = vpop.f32.mrf.mxu3  ;;  %v208_v48 = vadd.f32 %v192_v38, %v191_v37  ;;  %v230_v36 = vld [vmem:[%s491_s3 + $0x8] sm:$0xff] }
  0x90   :  { %v143_v41 = vadd.f32 %v142_v39, %v75_v22  ;;  %v183_v42 = vpop.f32.mrf.mxu2  ;;  %v229_v39 = vld [vmem:[%s491_s3] sm:$0xff] }
  0x91   :  { %v130_v43 = vpop.f32.mrf.mxu0  ;;  %v184_v44 = vadd.f32 %v183_v42, %v75_v22  ;;  %v235_v22 = vld [vmem:[%s491_s3 + $0x30] sm:$0xff] }
  0x92   :  { %v171_v45 = vpop.f32.mrf.mxu1  ;;  %v201_v46 = vmax.f32 %v143_v41, 0.0  ;;  %v131_v49 = vadd.f32 %v130_v43, %v55_v40  ;;  %v245_v43 = vld [vmem:[%s492_s4] sm:$0x3] }
  0x93   :  { %v202_v47 = vmax.f32 %v184_v44, 0.0  ;;  %v172_v50 = vadd.f32 %v171_v45, %v55_v40  ;;  %v315_v44 = vld [vmem:[%s493_s5] ss:$0 sm:$0xff] }
  0x94   :  { %v193_v52 = vmax.f32 %v131_v49, 0.0 }
  0x95   :  { %v223_v51 = vadd.f32 %v202_v47, %v201_v46  ;;  %v194_v53 = vmax.f32 %v172_v50, 0.0 }
  0x97   :  { %224 = vadd.xlane.f32.xlu0 %v223_v51  ;;  %209 = vadd.xlane.f32.xlu1 %v208_v48  ;;  %v145_v54 = vpop.f32.mrf.mxu3  ;;  %v211_v0 = vadd.f32 %v194_v53, %v193_v52 }
  0x98   :  { %v146_v55 = vadd.f32 %v145_v54, %v80_v19  ;;  %v186_v56 = vpop.f32.mrf.mxu2 }
  0x99   :  { %v133_v57 = vpop.f32.mrf.mxu0  ;;  %v187_v58 = vadd.f32 %v186_v56, %v80_v19  ;;  %v236_v19 = vld [vmem:[%s491_s3 + $0x38] sm:$0xff] }
  0x9a   :  { %v174_v59 = vpop.f32.mrf.mxu1  ;;  %v203_v60 = vmax.f32 %v146_v55, 0.0  ;;  %v134_v62 = vadd.f32 %v133_v57, %v60_v23 }
  0x9b   :  { %v204_v61 = vmax.f32 %v187_v58, 0.0  ;;  %v175_v63 = vadd.f32 %v174_v59, %v60_v23 }
  0x9c   :  { %v195_v2 = vmax.f32 %v134_v62, 0.0 }
  0x9d   :  { %v226_v1 = vadd.f32 %v204_v61, %v203_v60  ;;  %v196_v3 = vmax.f32 %v175_v63, 0.0 }
  0x9f   :  { %227 = vadd.xlane.f32.xlu2 %v226_v1  ;;  %212 = vadd.xlane.f32.xlu0 %v211_v0  ;;  %v214_v7 = vadd.f32 %v196_v3, %v195_v2 }
  0xa1   :  { %v136_v5 = vpop.f32.mrf.mxu0 }
  0xa2   :  { %v177_v6 = vpop.f32.mrf.mxu1  ;;  %v137_v8 = vadd.f32 %v136_v5, %v65_v4 }
  0xa3   :  { %v178_v9 = vadd.f32 %v177_v6, %v65_v4 }
  0xa4   :  { %v197_v10 = vmax.f32 %v137_v8, 0.0 }
  0xa5   :  { %v198_v11 = vmax.f32 %v178_v9, 0.0 }
  0xa7   :  { %215 = vadd.xlane.f32.xlu2 %v214_v7  ;;  %v217_v15 = vadd.f32 %v198_v11, %v197_v10 }
  0xaf   :  { %218 = vadd.xlane.f32.xlu2 %v217_v15 }
  0xb7   :  { %206 = vadd.xlane.f32.xlu2 %v205_v18 }
 0x102   :  { %v222_v21 = vpop.xlane.xlu1 %221 }
 0x103   :  { %v242_v27 = vmul.f32 %v234_v20, %v222_v21 }
 0x10a   :  { %v225_v23 = vpop.xlane.xlu0 %224  ;;  %v210_v37 = vpop.xlane.xlu1 %209 }
 0x10b   :  { %v243_v26 = vmul.f32 %v235_v22, %v225_v23  ;;  %v238_v40 = vmul.f32 %v230_v36, %v210_v37 }
 0x112   :  { %v228_v24 = vpop.xlane.xlu2 %227  ;;  %v213_v34 = vpop.xlane.xlu0 %212 }
 0x113   :  { %v244_v25 = vmul.f32 %v236_v19, %v228_v24  ;;  %v239_v38 = vmul.f32 %v231_v33, %v213_v34 }
 0x115   :  { %262 = vmatpush.msrb.mxu2 %v244_v25 }
 0x117   :  { %263 = vmatpush.msrb.mxu2 %v243_v26 }
 0x119   :  { %264 = vmatpush.msrb.mxu2 %v242_v27 }
 0x11a   :  { %v216_v28 = vpop.xlane.xlu2 %215 }
 0x11b   :  { %v240_v35 = vmul.f32 %v232_v30, %v216_v28 }
 0x122   :  { %v219_v31 = vpop.xlane.xlu2 %218 }
 0x123   :  { %v241_v32 = vmul.f32 %v233_v29, %v219_v31 }
 0x125   :  { %265 = vmatpush.msrb.mxu2 %v241_v32 }
 0x127   :  { %266 = vmatpush.msrb.mxu2 %v240_v35 }
 0x129   :  { %267 = vmatpush.msrb.mxu2 %v239_v38 }
 0x12a   :  { %v207_v41 = vpop.xlane.xlu2 %206 }
 0x12b   :  { %v237_v42 = vmul.f32 %v229_v39, %v207_v41  ;;  %268 = vmatpush.msrb.mxu2 %v238_v40 }
 0x12d   :  { %269 = vmatpush.msrb.mxu2 %v237_v42 }
 0x12e   :  { %307 = vmatmul.msk.f32.vlgmr.msrb.gmra.mxu2 %vm250_vm1, %v245_v43 }
 0x1b1   :  { %v271_v45 = vpop.f32.mrf.mxu2 }
 0x1b2   :  { %v272_v46 = vadd.f32 %v315_v44, %v271_v45 }
 0x1b4   :  { %274 = vst [vmem:[#allocation2] sm:$0x3] %v272_v46 }
 0x1b5   :  { %285 = dma.vmem_to_hbm [thread:$0]  %s281_s26, 32, %s283_s28, [#allocation3]  }
 0x1b6   :  { %340 = dma.done.wait [#allocation3], 32  }
 0x1b7   :  { %341 = vsyncadd [#allocation3], 4294967264 }
 0x1b8   :  { %290 = vsyncpa [#allocation3], 1 }

</bundles_post_ra>
